<compile_context>
chip_gen: v5e
topology: v5e:2x2
jax: 0.10.0
libtpu: 0.0.40
codegen_flags: <defaults>
</compile_context>

<pallas_src>
import jax
import jax.numpy as jnp
from jax.experimental import pallas as pl
from jax.experimental.pallas import tpu as pltpu

_VMEM_LIMIT_BYTES = 48 * 1024 * 1024  # headroom under v7x's 64 MiB physical VMEM


def make_position_encoding(d_model: int, max_len: int, dtype=jnp.float32):
    """Deterministic buffer matching PositionEncoding.__init__ (odd d_model safe)."""
    position = jnp.arange(0, max_len, 1, dtype=jnp.float32)[:, None]       # (max_len, 1)
    embedding_index = jnp.arange(0, d_model, 2, dtype=jnp.float32)         # (ceil(d/2),)
    div_term = 1.0 / jnp.power(jnp.float32(10000.0), embedding_index / d_model)
    angles = position * div_term                                           # (max_len, ceil(d/2))
    pe = jnp.zeros((max_len, d_model), dtype=jnp.float32)
    pe = pe.at[:, 0::2].set(jnp.sin(angles))
    pe = pe.at[:, 1::2].set(jnp.cos(angles[:, : d_model // 2]))
    return pe.astype(dtype)


def _add_kernel(x_ref, pe_ref, o_ref):
    # Pure elementwise add on identically-shaped VMEM tiles (VPU-bound per tile,
    # HBM-bound overall).
    o_ref[...] = x_ref[...] + pe_ref[...]


def _sublane_multiple(dtype) -> int:
    # f32 -> 8, bf16/f16 -> 16, int8/fp8 -> 32 (packing along sublanes).
    return max(8, 32 // jnp.dtype(dtype).itemsize)


def _tiled_2d_add(x, pe, sub):
    """Main path: d_model % 128 == 0 and seq_len % sub == 0. pe passed un-sliced."""
    seq_len, d_model = x.shape
    tile_s = min(seq_len, 512)          # multiple of `sub` (512 % 32 == 0)
    tile_d = min(d_model, 512)          # multiple of 128
    grid = (pl.cdiv(seq_len, tile_s), pl.cdiv(d_model, tile_d))
    return pl.pallas_call(
        _add_kernel,
        out_shape=jax.ShapeDtypeStruct((seq_len, d_model), x.dtype),
        grid=grid,
        in_specs=[
            pl.BlockSpec((tile_s, tile_d), lambda i, j: (i, j)),   # x tile
            pl.BlockSpec((tile_s, tile_d), lambda i, j: (i, j)),   # pe tile: reads first
            # seq_len rows of the full (max_len, d_model) buffer; no pre-slice copy.
        ],
        out_specs=pl.BlockSpec((tile_s, tile_d), lambda i, j: (i, j)),
        input_output_aliases={0: 0},  # out reuses x's buffer (x += pe)
        compiler_params=pltpu.CompilerParams(
            dimension_semantics=("parallel", "parallel"),
            vmem_limit_bytes=_VMEM_LIMIT_BYTES,
        ),
    )(x, pe)


def _lane_dense_add(x, pe_slice, sub):
    """Fallback for lane-sparse d_model (< 128 or not a multiple of 128).

    Folds the elementwise add into a (rows, 128) layout so every vector
    load/store uses all 128 lanes (unmasked vst) instead of masked partial
    stores. Pure layout plumbing; pads up to a full (sub, 128) tile.
    """
    seq_len, d_model = x.shape
    total = seq_len * d_model
    lane = 128
    chunk = sub * lane
    pad_total = ((total + chunk - 1) // chunk) * chunk

    xf = x.reshape(-1)
    pf = pe_slice.reshape(-1)
    if pad_total != total:
        xf = jnp.pad(xf, (0, pad_total - total))
        pf = jnp.pad(pf, (0, pad_total - total))

    rows = pad_total // lane            # multiple of `sub` by construction
    x2 = xf.reshape(rows, lane)
    p2 = pf.reshape(rows, lane)

    tile_r = min(rows, 1024)            # multiple of `sub` (1024 % 32 == 0)
    grid = (pl.cdiv(rows, tile_r),)

    out2 = pl.pallas_call(
        _add_kernel,
        out_shape=jax.ShapeDtypeStruct((rows, lane), x.dtype),
        grid=grid,
        in_specs=[
            pl.BlockSpec((tile_r, lane), lambda i: (i, 0)),
            pl.BlockSpec((tile_r, lane), lambda i: (i, 0)),
        ],
        out_specs=pl.BlockSpec((tile_r, lane), lambda i: (i, 0)),
        input_output_aliases={0: 0},
        compiler_params=pltpu.CompilerParams(
            dimension_semantics=("parallel",),
            vmem_limit_bytes=_VMEM_LIMIT_BYTES,
        ),
    )(x2, p2)

    return out2.reshape(-1)[:total].reshape(seq_len, d_model)


def position_encoding_forward(word_embeddings: jax.Array, pe: jax.Array,
                              *, min_pallas_elements: int = 0) -> jax.Array:
    """Equivalent of PositionEncoding.forward(word_embeddings)."""
    seq_len, d_model = word_embeddings.shape
    pe = pe.astype(word_embeddings.dtype)   # avoid f32-promote / bf16-store mismatch

    # For genuinely tiny inputs, launch overhead dominates a memory-bound add;
    # let XLA fuse a plain add instead (disabled by default so the demo runs
    # the Pallas kernel).
    if seq_len * d_model < min_pallas_elements:
        return word_embeddings + pe[:seq_len, :]

    sub = _sublane_multiple(word_embeddings.dtype)
    if d_model % 128 == 0 and seq_len % sub == 0:
        # pe passed un-sliced; index_map bounds reads to the first seq_len rows.
        return _tiled_2d_add(word_embeddings, pe, sub)
    # Lane-sparse shapes: slice (tiny) and fold into a lane-dense layout.
    return _lane_dense_add(word_embeddings, pe[:seq_len, :], sub)


if __name__ == "__main__":
    key = jax.random.PRNGKey(0)
    k1, k2 = jax.random.split(key)

    fwd = jax.jit(position_encoding_forward)

    # Case 1: module-like tiny shape (d_model=32 < 128 -> lane-dense folded path).
    d_model, max_len, seq_len = 32, 16, 8
    x_small = jax.random.normal(k1, (seq_len, d_model), dtype=jnp.float32)
    pe_small = make_position_encoding(d_model=d_model, max_len=max_len)
    ref_small = x_small + pe_small[:seq_len, :]
    out_small = jax.block_until_ready(fwd(x_small, pe_small))
    assert out_small.shape == (seq_len, d_model)
    assert out_small.dtype == x_small.dtype
    assert jnp.allclose(out_small, ref_small, atol=1e-6), "mismatch (lane-dense path)"

    # Case 2: lane-dense d_model (multiple of 128) -> tiled 2-D grid path,
    # multiple grid steps along seq, pe read directly from an oversize buffer.
    d_model2, max_len2, seq_len2 = 256, 1536, 1024
    x_big = jax.random.normal(k2, (seq_len2, d_model2), dtype=jnp.float32)
    pe_big = make_position_encoding(d_model=d_model2, max_len=max_len2)
    ref_big = x_big + pe_big[:seq_len2, :]
    out_big = jax.block_until_ready(fwd(x_big, pe_big))
    assert out_big.shape == (seq_len2, d_model2)
    assert jnp.allclose(out_big, ref_big, atol=1e-6), "mismatch (tiled 2-D path)"

    print("KERNEL_OK")
</pallas_src>

<mosaic_0001>
module attributes {stable_mosaic.version = 11 : i64} {
  func.func @_add_kernel(%arg0: i32, %arg1: memref<8x128xf32, #tpu.memory_space<vmem>>, %arg2: memref<8x128xf32, #tpu.memory_space<vmem>>, %arg3: memref<8x128xf32, #tpu.memory_space<vmem>>) attributes {dimension_semantics = [#tpu.dimension_semantics<parallel>], iteration_bounds = array<i64: 1>, scalar_prefetch = 0 : i64, scratch_operands = 0 : i64, tpu.core_type = #tpu.core_type<tc>, window_params = [{transform_indices = @transform_0, window_bounds = array<i64: 8, 128>}, {transform_indices = @transform_1, window_bounds = array<i64: 8, 128>}, {transform_indices = @transform_2, window_bounds = array<i64: 8, 128>}]} {
    %c0 = arith.constant 0 : index
    %c0_0 = arith.constant 0 : index
    %0 = vector.load %arg1[%c0, %c0_0] : memref<8x128xf32, #tpu.memory_space<vmem>>, vector<8x128xf32>
    %c0_1 = arith.constant 0 : index
    %c0_2 = arith.constant 0 : index
    %1 = vector.load %arg2[%c0_1, %c0_2] : memref<8x128xf32, #tpu.memory_space<vmem>>, vector<8x128xf32>
    %2 = arith.addf %0, %1 : vector<8x128xf32>
    %c0_3 = arith.constant 0 : index
    %c0_4 = arith.constant 0 : index
    %3 = vector.load %arg3[%c0_3, %c0_4] : memref<8x128xf32, #tpu.memory_space<vmem>>, vector<8x128xf32>
    tpu.vector_store %arg3[%c0_3, %c0_4], %2 {strides = array<i32>} : memref<8x128xf32, #tpu.memory_space<vmem>>, vector<8x128xf32>,
    return
  }
  func.func @transform_0(%arg0: i32) -> (i32, i32) {
    %c0_i32 = arith.constant 0 : i32
    %c0_i32_0 = arith.constant 0 : i32
    return %arg0, %c0_i32 : i32, i32
  }
  func.func @transform_1(%arg0: i32) -> (i32, i32) {
    %c0_i32 = arith.constant 0 : i32
    %c0_i32_0 = arith.constant 0 : i32
    return %arg0, %c0_i32 : i32, i32
  }
  func.func @transform_2(%arg0: i32) -> (i32, i32) {
    %c0_i32 = arith.constant 0 : i32
    %c0_i32_0 = arith.constant 0 : i32
    return %arg0, %c0_i32 : i32, i32
  }
}

</mosaic_0001>

<bundles_post_ra>
// kernel: position_encoding_forward.1
= control target key start
LH: loop header
LB: loop body
LE: loop exit
PB: predicated region body
PF: predicated region fallthrough
CT: control target
= control target key end

     0   :  { %s43_s0 = inlined_call_operand.vmem [shape: f32[8,128], index: 0, kind: input, shape index: {}, may-alias: {0,2}]   ;;  %s44_s1 = inlined_call_operand.vmem [shape: f32[8,128], index: 1, kind: input, shape index: {}]   ;;  %s45_s2 = inlined_call_operand.vmem [shape: f32[8,128], index: 2, kind: output, shape index: {}, may-alias: {0,2}]  }
   0x1   :  { %v11_v0 = vld [vmem:[%s43_s0] sm:$0xff] }
   0x2   :  { %v12_v1 = vld [vmem:[%s44_s1] sm:$0xff] }
   0x3   :  { %v13_v2 = vadd.f32 %v12_v1, %v11_v0 }
   0x5   :  { %14 = vst [vmem:[%s45_s2] sm:$0xff] %v13_v2 }

</bundles_post_ra>
